<compile_context>
chip_gen: v7x
topology: tpu7x:2x2x1
jax: 0.10.0
libtpu: 0.0.40
codegen_flags: <defaults>
</compile_context>

<pallas_src>
import functools

import jax
import jax.numpy as jnp
from jax.experimental import pallas as pl
from jax.experimental.pallas import tpu as pltpu  # noqa: F401  (TPU backend)


def _round_up(x, m):
    return ((x + m - 1) // m) * m


def _gcn_fused_kernel(*refs, num_layers, xw_first, compute_dtype):
    """Fused multi-layer GCN:  H_{i+1} = relu(A @ H_i @ W_i + b_i), last layer
    without relu.  refs = (adj, x, w0, b0, w1, b1, ..., out)."""
    adj = refs[0][...].astype(compute_dtype)
    h = refs[1][...].astype(compute_dtype)
    o_ref = refs[-1]

    h32 = None
    for i in range(num_layers):
        w = refs[2 + 2 * i][...].astype(compute_dtype)
        b = refs[3 + 2 * i][...]                     # (1, F_pad) f32 bias
        if xw_first[i]:
            # Cheaper to shrink the feature dim before the N x N matmul.
            xw = jnp.dot(h, w, preferred_element_type=jnp.float32)
            h32 = jnp.dot(adj, xw.astype(compute_dtype),
                          preferred_element_type=jnp.float32)
        else:
            ax = jnp.dot(adj, h, preferred_element_type=jnp.float32)
            h32 = jnp.dot(ax.astype(compute_dtype), w,
                          preferred_element_type=jnp.float32)
        h32 = h32 + b                                # epilogue in f32
        if i < num_layers - 1:
            h32 = jnp.maximum(h32, 0.0)
            h = h32.astype(compute_dtype)

    o_ref[...] = h32.astype(o_ref.dtype)


def gcn_forward(x, adj, params, *, compute_dtype=jnp.bfloat16):
    """Fused GCN forward.  x: (N, F_in) f32, adj: (N, N) f32,
    params: list of (W (F_in, F_out) f32, b (1, F_out) f32)."""
    n, f_in = x.shape
    num_layers = len(params)
    dims = [f_in] + [w.shape[1] for (w, _) in params]
    pdims = [_round_up(d, 128) for d in dims]        # lane-dense feature dims

    # Pad features/weights/bias to 128-lane multiples (zero padding is exact).
    x_p = jnp.pad(x, ((0, 0), (0, pdims[0] - dims[0]))).astype(compute_dtype)
    adj_c = adj.astype(compute_dtype)

    flat_wb = []
    xw_first = []
    for i, (w, b) in enumerate(params):
        wp = jnp.pad(w, ((0, pdims[i] - dims[i]),
                         (0, pdims[i + 1] - dims[i + 1]))).astype(compute_dtype)
        bp = jnp.pad(b.reshape(1, -1),
                     ((0, 0), (0, pdims[i + 1] - dims[i + 1]))).astype(jnp.float32)
        flat_wb += [wp, bp]
        # (X @ W) first when the output feature dim is narrower than the input.
        xw_first.append(dims[i + 1] < dims[i])

    inputs = [adj_c, x_p] + flat_wb
    out_pad = pdims[-1]

    kernel = functools.partial(
        _gcn_fused_kernel,
        num_layers=num_layers,
        xw_first=tuple(xw_first),
        compute_dtype=compute_dtype,
    )

    # Advisory cost estimate (padded-dim FLOPs, all bytes moved once).
    flops = 0
    for i in range(num_layers):
        f_nn = pdims[i + 1] if xw_first[i] else pdims[i]
        flops += 2 * n * n * f_nn + 2 * n * pdims[i] * pdims[i + 1]
    bytes_accessed = sum(int(a.size) * a.dtype.itemsize for a in inputs)
    bytes_accessed += n * out_pad * 4

    out = pl.pallas_call(
        kernel,
        out_shape=jax.ShapeDtypeStruct((n, out_pad), jnp.float32),
        in_specs=[pl.BlockSpec(a.shape, lambda: (0, 0)) for a in inputs],
        out_specs=pl.BlockSpec((n, out_pad), lambda: (0, 0)),
        cost_estimate=pl.CostEstimate(
            flops=int(flops), transcendentals=0,
            bytes_accessed=int(bytes_accessed)),
    )(*inputs)

    return out[:, : dims[-1]]


def gcn_reference(x, adj, params, *, compute_dtype=jnp.bfloat16):
    """Pure-JAX reference with the same precision & association as the kernel."""
    adj_c = adj.astype(compute_dtype)
    h = x
    num_layers = len(params)
    for i, (w, b) in enumerate(params):
        f_in_i, f_out_i = w.shape
        hc = h.astype(compute_dtype)
        wc = w.astype(compute_dtype)
        if f_out_i < f_in_i:
            t = jnp.dot(hc, wc, preferred_element_type=jnp.float32)
            h = jnp.dot(adj_c, t.astype(compute_dtype),
                        preferred_element_type=jnp.float32)
        else:
            t = jnp.dot(adj_c, hc, preferred_element_type=jnp.float32)
            h = jnp.dot(t.astype(compute_dtype), wc,
                        preferred_element_type=jnp.float32)
        h = h + b.reshape(1, -1)
        if i < num_layers - 1:
            h = jnp.maximum(h, 0.0)
    return h


def init_gcn_params(key, in_channels, hidden_channels, out_channels, num_layers):
    """Linear-layer params matching the PyTorch module's shapes.
    PyTorch Linear(in, out) stores weight (out, in); we keep (in, out) so the
    kernel computes x @ W + b directly."""
    dims = [in_channels] + [hidden_channels] * (num_layers - 1) + [out_channels]
    params = []
    for i in range(num_layers):
        fan_in, fan_out = dims[i], dims[i + 1]
        key, kw, kb = jax.random.split(key, 3)
        bound = 1.0 / jnp.sqrt(jnp.float32(fan_in))
        w = jax.random.uniform(kw, (fan_in, fan_out), jnp.float32, -bound, bound)
        b = jax.random.uniform(kb, (1, fan_out), jnp.float32, -bound, bound)
        params.append((w, b))
    return params


if __name__ == "__main__":
    # Small shapes: N=64 nodes, in=16, hidden=32, out=8, 3 GCN layers.
    N, IN_C, HID_C, OUT_C, NUM_LAYERS = 64, 16, 32, 8, 3

    key = jax.random.PRNGKey(0)
    key, kx, ka = jax.random.split(key, 3)

    x = jax.random.normal(kx, (N, IN_C), jnp.float32)
    # Symmetric normalized-ish adjacency with self loops (dense, synthetic).
    raw = jax.random.uniform(ka, (N, N), jnp.float32)
    adj = (raw > 0.8).astype(jnp.float32)
    adj = adj + adj.T + jnp.eye(N, dtype=jnp.float32)
    deg = jnp.sum(adj, axis=1, keepdims=True)
    adj = adj / jnp.maximum(deg, 1.0)

    params = init_gcn_params(key, IN_C, HID_C, OUT_C, NUM_LAYERS)

    out = gcn_forward(x, adj, params)
    jax.block_until_ready(out)

    ref = gcn_reference(x, adj, params)
    assert out.shape == (N, OUT_C), out.shape
    assert jnp.allclose(out, ref, atol=1e-2, rtol=1e-2), (
        float(jnp.max(jnp.abs(out - ref))))

    # TODO(synk): batch_norm / dropout / residual / graph_task branches of the
    # PyTorch module are disabled in the default config and not implemented.
    print("KERNEL_OK")
</pallas_src>

<mosaic_0001>
module attributes {stable_mosaic.version = 11 : i64} {
  func.func @_gcn_fused_kernel(%arg0: memref<64x64xbf16, #tpu.memory_space<vmem>>, %arg1: memref<64x128xbf16, #tpu.memory_space<vmem>>, %arg2: memref<128x128xbf16, #tpu.memory_space<vmem>>, %arg3: memref<1x128xf32, #tpu.memory_space<vmem>>, %arg4: memref<128x128xbf16, #tpu.memory_space<vmem>>, %arg5: memref<1x128xf32, #tpu.memory_space<vmem>>, %arg6: memref<128x128xbf16, #tpu.memory_space<vmem>>, %arg7: memref<1x128xf32, #tpu.memory_space<vmem>>, %arg8: memref<64x128xf32, #tpu.memory_space<vmem>>) attributes {dimension_semantics = [], scalar_prefetch = 0 : i64, scratch_operands = 0 : i64, tpu.core_type = #tpu.core_type<tc>} {
    %c0 = arith.constant 0 : index
    %c0_0 = arith.constant 0 : index
    %0 = vector.load %arg0[%c0, %c0_0] : memref<64x64xbf16, #tpu.memory_space<vmem>>, vector<64x64xbf16>
    %c0_1 = arith.constant 0 : index
    %c0_2 = arith.constant 0 : index
    %1 = vector.load %arg1[%c0_1, %c0_2] : memref<64x128xbf16, #tpu.memory_space<vmem>>, vector<64x128xbf16>
    %c0_3 = arith.constant 0 : index
    %c0_4 = arith.constant 0 : index
    %2 = vector.load %arg2[%c0_3, %c0_4] : memref<128x128xbf16, #tpu.memory_space<vmem>>, vector<128x128xbf16>
    %c0_5 = arith.constant 0 : index
    %c0_6 = arith.constant 0 : index
    %3 = vector.load %arg3[%c0_5, %c0_6] : memref<1x128xf32, #tpu.memory_space<vmem>>, vector<1x128xf32>
    %cst = arith.constant dense<0.000000e+00> : vector<64x128xf32>
    %4 = tpu.matmul %0, %1, %cst {dimension_numbers = #tpu.dot_dimension_numbers<[1], [0], [0], [1], [0, 0, 1, 1], [], []>} : vector<64x64xbf16>, vector<64x128xbf16>, vector<64x128xf32> -> vector<64x128xf32>
    %5 = arith.truncf %4 : vector<64x128xf32> to vector<64x128xbf16>
    %cst_7 = arith.constant dense<0.000000e+00> : vector<64x128xf32>
    %6 = tpu.matmul %5, %2, %cst_7 {dimension_numbers = #tpu.dot_dimension_numbers<[1], [0], [0], [1], [0, 0, 1, 1], [], []>} : vector<64x128xbf16>, vector<128x128xbf16>, vector<64x128xf32> -> vector<64x128xf32>
    %7 = vector.broadcast %3 : vector<1x128xf32> to vector<64x128xf32>
    %8 = arith.addf %6, %7 : vector<64x128xf32>
    %cst_8 = arith.constant 0.000000e+00 : f32
    %9 = vector.broadcast %cst_8 : f32 to vector<64x128xf32>
    %10 = arith.maximumf %8, %9 : vector<64x128xf32>
    %11 = arith.truncf %10 : vector<64x128xf32> to vector<64x128xbf16>
    %c0_9 = arith.constant 0 : index
    %c0_10 = arith.constant 0 : index
    %12 = vector.load %arg4[%c0_9, %c0_10] : memref<128x128xbf16, #tpu.memory_space<vmem>>, vector<128x128xbf16>
    %c0_11 = arith.constant 0 : index
    %c0_12 = arith.constant 0 : index
    %13 = vector.load %arg5[%c0_11, %c0_12] : memref<1x128xf32, #tpu.memory_space<vmem>>, vector<1x128xf32>
    %cst_13 = arith.constant dense<0.000000e+00> : vector<64x128xf32>
    %14 = tpu.matmul %0, %11, %cst_13 {dimension_numbers = #tpu.dot_dimension_numbers<[1], [0], [0], [1], [0, 0, 1, 1], [], []>} : vector<64x64xbf16>, vector<64x128xbf16>, vector<64x128xf32> -> vector<64x128xf32>
    %15 = arith.truncf %14 : vector<64x128xf32> to vector<64x128xbf16>
    %cst_14 = arith.constant dense<0.000000e+00> : vector<64x128xf32>
    %16 = tpu.matmul %15, %12, %cst_14 {dimension_numbers = #tpu.dot_dimension_numbers<[1], [0], [0], [1], [0, 0, 1, 1], [], []>} : vector<64x128xbf16>, vector<128x128xbf16>, vector<64x128xf32> -> vector<64x128xf32>
    %17 = vector.broadcast %13 : vector<1x128xf32> to vector<64x128xf32>
    %18 = arith.addf %16, %17 : vector<64x128xf32>
    %cst_15 = arith.constant 0.000000e+00 : f32
    %19 = vector.broadcast %cst_15 : f32 to vector<64x128xf32>
    %20 = arith.maximumf %18, %19 : vector<64x128xf32>
    %21 = arith.truncf %20 : vector<64x128xf32> to vector<64x128xbf16>
    %c0_16 = arith.constant 0 : index
    %c0_17 = arith.constant 0 : index
    %22 = vector.load %arg6[%c0_16, %c0_17] : memref<128x128xbf16, #tpu.memory_space<vmem>>, vector<128x128xbf16>
    %c0_18 = arith.constant 0 : index
    %c0_19 = arith.constant 0 : index
    %23 = vector.load %arg7[%c0_18, %c0_19] : memref<1x128xf32, #tpu.memory_space<vmem>>, vector<1x128xf32>
    %cst_20 = arith.constant dense<0.000000e+00> : vector<64x128xf32>
    %24 = tpu.matmul %21, %22, %cst_20 {dimension_numbers = #tpu.dot_dimension_numbers<[1], [0], [0], [1], [0, 0, 1, 1], [], []>} : vector<64x128xbf16>, vector<128x128xbf16>, vector<64x128xf32> -> vector<64x128xf32>
    %25 = arith.truncf %24 : vector<64x128xf32> to vector<64x128xbf16>
    %cst_21 = arith.constant dense<0.000000e+00> : vector<64x128xf32>
    %26 = tpu.matmul %0, %25, %cst_21 {dimension_numbers = #tpu.dot_dimension_numbers<[1], [0], [0], [1], [0, 0, 1, 1], [], []>} : vector<64x64xbf16>, vector<64x128xbf16>, vector<64x128xf32> -> vector<64x128xf32>
    %27 = vector.broadcast %23 : vector<1x128xf32> to vector<64x128xf32>
    %28 = arith.addf %26, %27 : vector<64x128xf32>
    %c0_22 = arith.constant 0 : index
    %c0_23 = arith.constant 0 : index
    %29 = vector.load %arg8[%c0_22, %c0_23] : memref<64x128xf32, #tpu.memory_space<vmem>>, vector<64x128xf32>
    tpu.vector_store %arg8[%c0_22, %c0_23], %28 {strides = array<i32>} : memref<64x128xf32, #tpu.memory_space<vmem>>, vector<64x128xf32>,
    return
  }
}

</mosaic_0001>

<bundles_post_ra>
// kernel: tpu_custom_call.1
= control target key start
LH: loop header
LB: loop body
LE: loop exit
PB: predicated region body
PF: predicated region fallthrough
CT: control target
= control target key end

     0   :  { %13 = vsyncpa [#allocation3], 0  ;;  %s1452_s0 = inlined_call_operand.hbm [shape: bf16[64,64], index: 0, kind: input, shape index: {}]   ;;  %s1453_s1 = inlined_call_operand.hbm [shape: bf16[64,128], index: 1, kind: input, shape index: {}]   ;;  %s1454_s2 = inlined_call_operand.hbm [shape: bf16[128,128], index: 2, kind: input, shape index: {}]   ;;  %s1455_s3 = inlined_call_operand.vmem [shape: f32[1,128], index: 3, kind: input, shape index: {}]   ;;  %s1456_s4 = inlined_call_operand.hbm [shape: bf16[128,128], index: 4, kind: input, shape index: {}]   ;;  %s1457_s5 = inlined_call_operand.vmem [shape: f32[1,128], index: 5, kind: input, shape index: {}]   ;;  %s1458_s6 = inlined_call_operand.hbm [shape: bf16[128,128], index: 6, kind: input, shape index: {}]   ;;  %s1459_s7 = inlined_call_operand.vmem [shape: f32[1,128], index: 7, kind: input, shape index: {}]   ;;  %s1460_s8 = inlined_call_operand.hbm [shape: f32[64,128], index: 8, kind: output, shape index: {}]  }
   0x1   :  { %14 = vsyncpa [#allocation6], 0 }
   0x2   :  { %15 = vsyncpa [#allocation9], 0 }
   0x3   :  { %16 = vsyncpa [#allocation4], 0  ;;  %s1255_s27 = smov [#allocation5]   ;;  %s1256_s29 = smov [#allocation8]  }
   0x4   :  { %s34_s28 = sshll.u32 %s1255_s27, 4  ;;  %s60_s30 = sshll.u32 %s1256_s29, 4  ;;  %s35_s28 = int_to_ptr.vmem [resolvable:$true] %s34_s28  ;;  %s1310_s30 = int_to_ptr.vmem [resolvable:$true] %s60_s30 }
   0x5   :  { %s1115_s11 = scalar_lea.hbm %s1453_s1, 512 }
   0x6   :  { %p1116_p0 = scmp.ne.s32.totalorder %s1453_s1, %s1115_s11  ;;  %p1119_p1 = scmp.lt.u32.totalorder %s1115_s11, %s1453_s1 }
   0x8   :  { %p1121_p2 = pnand %p1119_p1, %p1116_p0 }
   0xa   :  { %1124 = shalt.err (!%p1121_p2)
}
   0xb   :  { %s1125_s16 = scalar_lea.vmem %s35_s28, 512  ;;  %p1130_p4 = scmp.lt.s32.totalorder %s35_s28, %s35_s28 }
   0xc   :  { %p1126_p3 = scmp.ne.s32.totalorder %s35_s28, %s1125_s16  ;;  %p1131_p5 = scmp.lt.s32.totalorder %s1125_s16, %s1125_s16 }
   0xe   :  { %p1132_p6 = por %p1131_p5, %p1130_p4 }
  0x10   :  { %p1133_p7 = pnand %p1132_p6, %p1126_p3 }
  0x12   :  { %1136 = shalt.err (!%p1133_p7)
}
  0x13   :  { %s1257_s17 = smov 64   ;;  %s1258_s18 = smov 4  }
  0x14   :  { %40 = dma.hbm_to_vmem [thread:$0]  %s1453_s1, 512, %s35_s28, [#allocation6], %s1257_s17, %s1257_s17, %s1258_s18  }
  0x15   :  { %s1137_s23 = scalar_lea.hbm %s1456_s4, 1024 }
  0x16   :  { %p1138_p8 = scmp.ne.s32.totalorder %s1456_s4, %s1137_s23  ;;  %p1141_p9 = scmp.lt.u32.totalorder %s1137_s23, %s1456_s4 }
  0x18   :  { %p1143_p10 = pnand %p1141_p9, %p1138_p8 }
  0x1a   :  { %1146 = shalt.err (!%p1143_p10)
}
  0x1b   :  { %s1147_s29 = scalar_lea.vmem %s1310_s30, 1024  ;;  %p1152_p12 = scmp.lt.s32.totalorder %s1310_s30, %s1310_s30 }
  0x1c   :  { %p1148_p11 = scmp.ne.s32.totalorder %s1310_s30, %s1147_s29  ;;  %p1153_p13 = scmp.lt.s32.totalorder %s1147_s29, %s1147_s29 }
  0x1e   :  { %p1154_p0 = por %p1153_p13, %p1152_p12 }
  0x20   :  { %p1155_p1 = pnand %p1154_p0, %p1148_p11 }
  0x22   :  { %1158 = shalt.err (!%p1155_p1)
}
  0x23   :  { %66 = dma.hbm_to_vmem [thread:$0]  %s1456_s4, 1024, %s1310_s30, [#allocation9], %s1257_s17, %s1257_s17, %s1258_s18  }
  0x24   :  { %s1259_s9 = smov [#allocation2]   ;;  %s1260_s11 = smov [#allocation7]  }
  0x25   :  { %s22_s10 = sshll.u32 %s1259_s9, 4  ;;  %s46_s12 = sshll.u32 %s1260_s11, 4  ;;  %s23_s10 = int_to_ptr.vmem [resolvable:$true] %s22_s10  ;;  %s1347_s12 = int_to_ptr.vmem [resolvable:$true] %s46_s12 }
  0x26   :  { %s1159_s15 = scalar_lea.hbm %s1452_s0, 512 }
  0x27   :  { %p1160_p2 = scmp.ne.s32.totalorder %s1452_s0, %s1159_s15  ;;  %p1163_p3 = scmp.lt.u32.totalorder %s1159_s15, %s1452_s0 }
  0x29   :  { %p1165_p4 = pnand %p1163_p3, %p1160_p2 }
  0x2b   :  { %1168 = shalt.err (!%p1165_p4)
}
  0x2c   :  { %s1169_s4 = scalar_lea.vmem %s23_s10, 512  ;;  %p1174_p6 = scmp.lt.s32.totalorder %s23_s10, %s23_s10 }
  0x2d   :  { %p1170_p5 = scmp.ne.s32.totalorder %s23_s10, %s1169_s4  ;;  %p1175_p7 = scmp.lt.s32.totalorder %s1169_s4, %s1169_s4 }
  0x2f   :  { %p1176_p8 = por %p1175_p7, %p1174_p6 }
  0x31   :  { %p1177_p9 = pnand %p1176_p8, %p1170_p5 }
  0x33   :  { %1180 = shalt.err (!%p1177_p9)
}
  0x34   :  { %28 = dma.hbm_to_vmem [thread:$0]  %s1452_s0, 512, %s23_s10, [#allocation3], %s1257_s17, %s1257_s17, %s1258_s18  }
  0x35   :  { %s1181_s25 = scalar_lea.hbm %s1454_s2, 1024 }
  0x36   :  { %p1182_p10 = scmp.ne.s32.totalorder %s1454_s2, %s1181_s25  ;;  %p1185_p11 = scmp.lt.u32.totalorder %s1181_s25, %s1454_s2 }
  0x38   :  { %p1187_p12 = pnand %p1185_p11, %p1182_p10 }
  0x3a   :  { %1190 = shalt.err (!%p1187_p12)
}
  0x3b   :  { %s1191_s28 = scalar_lea.vmem %s1347_s12, 1024  ;;  %p1196_p0 = scmp.lt.s32.totalorder %s1347_s12, %s1347_s12 }
  0x3c   :  { %p1192_p13 = scmp.ne.s32.totalorder %s1347_s12, %s1191_s28  ;;  %p1197_p1 = scmp.lt.s32.totalorder %s1191_s28, %s1191_s28 }
  0x3e   :  { %p1198_p2 = por %p1197_p1, %p1196_p0 }
  0x40   :  { %p1199_p3 = pnand %p1198_p2, %p1192_p13 }
  0x42   :  { %1202 = shalt.err (!%p1199_p3)
}
  0x43   :  { %52 = dma.hbm_to_vmem [thread:$0]  %s1454_s2, 1024, %s1347_s12, [#allocation6], %s1257_s17, %s1257_s17, %s1258_s18  }
  0x44   :  { %s1261_s10 = smov [#allocation10]   ;;  %s1203_s15 = scalar_lea.hbm %s1458_s6, 1024 }
  0x45   :  { %s74_s11 = sshll.u32 %s1261_s10, 4  ;;  %p1204_p4 = scmp.ne.s32.totalorder %s1458_s6, %s1203_s15  ;;  %s75_s11 = int_to_ptr.vmem [resolvable:$true] %s74_s11 }
  0x46   :  { %p1207_p5 = scmp.lt.u32.totalorder %s1203_s15, %s1458_s6 }
  0x48   :  { %p1209_p6 = pnand %p1207_p5, %p1204_p4 }
  0x4a   :  { %1212 = shalt.err (!%p1209_p6)
}
  0x4b   :  { %s1213_s4 = scalar_lea.vmem %s75_s11, 1024  ;;  %p1218_p8 = scmp.lt.s32.totalorder %s75_s11, %s75_s11 }
  0x4c   :  { %p1214_p7 = scmp.ne.s32.totalorder %s75_s11, %s1213_s4  ;;  %p1219_p9 = scmp.lt.s32.totalorder %s1213_s4, %s1213_s4 }
  0x4e   :  { %p1220_p10 = por %p1219_p9, %p1218_p8 }
  0x50   :  { %p1221_p11 = pnand %p1220_p10, %p1214_p7 }
  0x52   :  { %1224 = shalt.err (!%p1221_p11)
}
  0x53   :  { %80 = dma.hbm_to_vmem [thread:$0]  %s1458_s6, 1024, %s75_s11, [#allocation9], %s1257_s17, %s1257_s17, %s1258_s18  }
  0x54   :  { %1247 = dma.done.wait [#allocation3], 512  }
  0x55   :  { %1248 = vsyncadd [#allocation3], 4294966784 }
  0x56   :  { %1249 = dma.done.wait [#allocation6], 1536  }
  0x57   :  { %1250 = vsyncadd [#allocation6], 4294965760 }
  0x58   :  { %1251 = dma.done.wait [#allocation9], 2048  }
  0x59   :  { %1252 = vsyncadd [#allocation9], 4294965248  ;;  %v1083_v0 = vld [vmem:[#allocation5] sm:$0xff]   ;;  %v1084_v1 = vld [vmem:[#allocation5 + $0x8] sm:$0xff]   ;;  %vm176_vm0 = vcmask 523264   ;;  %s1262_s22 = smov [#allocation11]  }
  0x5a   :  { %945 = vmatprep.subr.bf16.mxu0 %v1083_v0  ;;  %v1085_v2 = vld [vmem:[#allocation5 + $0x10] sm:$0xff]   ;;  %v1399_v3 = vld [vmem:[#allocation2] sm:$0xff]   ;;  %v1086_v4 = vld [vmem:[#allocation5 + $0x18] sm:$0xff]   ;;  %s824_s23 = sshll.u32 %s1262_s22, 4  ;;  %s825_s23 = int_to_ptr.vmem [resolvable:$true] %s824_s23 }
  0x5b   :  { %946 = vmatpush3.bf16.msra.mxu0 %v1083_v0  ;;  %953 = vmatprep.mubr.msk.bf16.mxu0 %vm176_vm0, %v1399_v3  ;;  %v1091_v5 = vld [vmem:[#allocation7] sm:$0xff]   ;;  %v1092_v6 = vld [vmem:[#allocation7 + $0x8] sm:$0xff]   ;;  %v1093_v8 = vld [vmem:[#allocation7 + $0x10] sm:$0xff]   ;;  %p1230_p13 = scmp.lt.s32.totalorder %s825_s23, %s825_s23 }
  0x5c   :  { %947 = vmatprep.subr.bf16.mxu0 %v1084_v1  ;;  %961 = vmatprep.subr.bf16.mxu1 %v1091_v5  ;;  %v1403_v7 = vld [vmem:[#allocation2 + $0x8] sm:$0xff]   ;;  %v1405_v9 = vld [vmem:[#allocation2 + $0x10] sm:$0xff]   ;;  %v1094_v10 = vld [vmem:[#allocation7 + $0x18] sm:$0xff]  }
  0x5d   :  { %962 = vmatpush3.bf16.msra.mxu1 %v1091_v5  ;;  %v1095_v11 = vld [vmem:[#allocation7 + $0x20] sm:$0xff]   ;;  %v1411_v12 = vld [vmem:[#allocation2 + $0x18] sm:$0xff]   ;;  %v1096_v13 = vld [vmem:[#allocation7 + $0x28] sm:$0xff]  }
  0x5e   :  { %963 = vmatprep.subr.bf16.mxu1 %v1092_v6  ;;  %v1097_v14 = vld [vmem:[#allocation7 + $0x30] sm:$0xff]   ;;  %v1098_v15 = vld [vmem:[#allocation7 + $0x38] sm:$0xff]   ;;  %v850_v28 = vld [vmem:[%s1455_s3] ss:$0 sm:$0xff] }
  0x5f   :  { %948 = vmatpush3.bf16.msra.mxu0 %v1084_v1  ;;  %v1099_v57 = vld [vmem:[#allocation8] sm:$0xff]   ;;  %v1100_v58 = vld [vmem:[#allocation8 + $0x8] sm:$0xff]   ;;  %v1101_v59 = vld [vmem:[#allocation8 + $0x10] sm:$0xff]  }
  0x60   :  { %949 = vmatprep.subr.bf16.mxu0 %v1085_v2  ;;  %v1102_v60 = vld [vmem:[#allocation8 + $0x18] sm:$0xff]   ;;  %v1103_v61 = vld [vmem:[#allocation8 + $0x20] sm:$0xff]   ;;  %v1104_v62 = vld [vmem:[#allocation8 + $0x28] sm:$0xff]  }
  0x61   :  { %964 = vmatpush3.bf16.msra.mxu1 %v1092_v6  ;;  %v1105_v63 = vld [vmem:[#allocation8 + $0x30] sm:$0xff]   ;;  %v1106_v0 = vld [vmem:[#allocation8 + $0x38] sm:$0xff]   ;;  %v1107_v1 = vld [vmem:[#allocation10] sm:$0xff]  }
  0x62   :  { %965 = vmatprep.subr.bf16.mxu1 %v1093_v8  ;;  %v1110_v5 = vld [vmem:[#allocation10 + $0x18] sm:$0xff]   ;;  %v1111_v6 = vld [vmem:[#allocation10 + $0x20] sm:$0xff]  }
  0x63   :  { %950 = vmatpush3.bf16.msra.mxu0 %v1085_v2  ;;  %v1108_v2 = vld [vmem:[#allocation10 + $0x8] sm:$0xff]  }
  0x64   :  { %951 = vmatprep.subr.bf16.mxu0 %v1086_v4 }
  0x65   :  { %966 = vmatpush3.bf16.msra.mxu1 %v1093_v8  ;;  %v1112_v8 = vld [vmem:[#allocation10 + $0x28] sm:$0xff]  }
  0x66   :  { %967 = vmatprep.subr.bf16.mxu1 %v1094_v10 }
  0x67   :  { %952 = vmatpush3.bf16.msra.mxu0 %v1086_v4  ;;  %v1109_v4 = vld [vmem:[#allocation10 + $0x10] sm:$0xff]  }
  0x69   :  { %968 = vmatpush3.bf16.msra.mxu1 %v1094_v10 }
  0x6a   :  { %954 = vmatmul.mubr.msk.bf16.vlgmr.msra.gmra.mrb[0].mxu0 %vm176_vm0, %v1403_v7  ;;  %969 = vmatprep.subr.bf16.mxu1 %v1095_v11 }
  0x6b   :  { %957 = vmatprep.mubr.msk.bf16.mxu0 %vm176_vm0, %v1405_v9 }
  0x6d   :  { %970 = vmatpush3.bf16.msra.mxu1 %v1095_v11 }
  0x6e   :  { %971 = vmatprep.subr.bf16.mxu1 %v1096_v13 }
  0x71   :  { %972 = vmatpush3.bf16.msra.mxu1 %v1096_v13 }
  0x72   :  { %958 = vmatmul.mubr.msk.bf16.gmra.mrb[4].mxu0 %vm176_vm0, %v1411_v12  ;;  %973 = vmatprep.subr.bf16.mxu1 %v1097_v14 }
  0x73   :  { %993 = vmatprep.mubr.msk.bf16.mxu0 %vm176_vm0, %v1399_v3 }
  0x75   :  { %974 = vmatpush3.bf16.msra.mxu1 %v1097_v14 }
  0x76   :  { %975 = vmatprep.subr.bf16.mxu1 %v1098_v15 }
  0x79   :  { %976 = vmatpush3.bf16.msra.mxu1 %v1098_v15 }
  0x7a   :  { %1025 = vmatprep.subr.bf16.mxu1 %v1107_v1 }
 0x13d   :  { %v955_v16 = vpop.f32.mrb[0].mxu0 }
 0x13e   :  { %v223_v17 = vpop.f32.mrb[1].mxu0 }
 0x13f   :  { %v956_v18 = vpop.f32.mrb[2].mxu0 }
 0x140   :  { %v255_v19 = vpack.c.bf16 %v956_v18, %v955_v16  ;;  %v226_v20 = vpop.f32.mrb[3].mxu0 }
 0x141   :  { %v254_v21 = vpack.c.bf16 %v226_v20, %v223_v17 }
 0x143   :  { %977 = vmatprep.mubr.bf16.mxu1 %v254_v21 }
 0x144   :  { %978 = vmatmul.mubr.bf16.vlgmr.msra.gmra.mrb[0].mxu1 %v255_v19 }
 0x145   :  { %v959_v22 = vpop.f32.mrb[4].mxu0  ;;  %1026 = vmatpush3.bf16.msra.mxu1 %v1107_v1 }
 0x146   :  { %v239_v23 = vpop.f32.mrb[5].mxu0  ;;  %1027 = vmatprep.subr.bf16.mxu1 %v1108_v2 }
 0x147   :  { %v960_v24 = vpop.f32.mrb[6].mxu0 }
 0x148   :  { %v257_v25 = vpack.c.bf16 %v960_v24, %v959_v22  ;;  %v242_v26 = vpop.f32.mrb[7].mxu0  ;;  %v1114_v24 = vld [vmem:[#allocation10 + $0x38] sm:$0xff]  }
 0x149   :  { %v256_v27 = vpack.c.bf16 %v242_v26, %v239_v23  ;;  %1028 = vmatpush3.bf16.msra.mxu1 %v1108_v2  ;;  %v1113_v23 = vld [vmem:[#allocation10 + $0x30] sm:$0xff]  }
 0x14a   :  { %1029 = vmatprep.subr.bf16.mxu1 %v1109_v4 }
 0x14b   :  { %981 = vmatprep.mubr.bf16.mxu1 %v256_v27 }
 0x14c   :  { %982 = vmatmul.mubr.bf16.gmra.mrb[4].mxu1 %v257_v25  ;;  %v863_v25 = vld [vmem:[%s1457_s5] ss:$0 sm:$0xff] }
 0x14d   :  { %1030 = vmatpush3.bf16.msra.mxu1 %v1109_v4 }
 0x14e   :  { %1031 = vmatprep.subr.bf16.mxu1 %v1110_v5 }
 0x151   :  { %1032 = vmatpush3.bf16.msra.mxu1 %v1110_v5 }
 0x152   :  { %1033 = vmatprep.subr.bf16.mxu1 %v1111_v6 }
 0x155   :  { %1034 = vmatpush3.bf16.msra.mxu1 %v1111_v6 }
 0x156   :  { %1035 = vmatprep.subr.bf16.mxu1 %v1112_v8 }
 0x159   :  { %1036 = vmatpush3.bf16.msra.mxu1 %v1112_v8 }
 0x15a   :  { %1037 = vmatprep.subr.bf16.mxu1 %v1113_v23 }
 0x15d   :  { %1038 = vmatpush3.bf16.msra.mxu1 %v1113_v23 }
 0x15e   :  { %1039 = vmatprep.subr.bf16.mxu1 %v1114_v24 }
 0x161   :  { %1040 = vmatpush3.bf16.msra.mxu1 %v1114_v24 }
 0x217   :  { %v979_v29 = vpop.f32.mrb[0].mxu1 }
 0x218   :  { %v355_v30 = vadd.f32 %v979_v29, %v850_v28  ;;  %v346_v31 = vpop.f32.mrb[1].mxu1 }
 0x219   :  { %v347_v32 = vadd.f32 %v850_v28, %v346_v31  ;;  %v980_v33 = vpop.f32.mrb[2].mxu1 }
 0x21a   :  { %v358_v34 = vadd.f32 %v980_v33, %v850_v28  ;;  %v349_v35 = vpop.f32.mrb[3].mxu1  ;;  %v379_v37 = vmax.f32 %v355_v30, 0.0 }
 0x21b   :  { %v350_v36 = vadd.f32 %v850_v28, %v349_v35  ;;  %v377_v39 = vmax.f32 %v347_v32, 0.0 }
 0x21c   :  { %v380_v38 = vmax.f32 %v358_v34, 0.0 }
 0x21d   :  { %v378_v40 = vmax.f32 %v350_v36, 0.0 }
 0x21e   :  { %v386_v41 = vpack.c.bf16 %v380_v38, %v379_v37 }
 0x21f   :  { %v385_v42 = vpack.c.bf16 %v378_v40, %v377_v39  ;;  %v983_v43 = vpop.f32.mrb[4].mxu1 }
 0x220   :  { %v371_v44 = vadd.f32 %v983_v43, %v850_v28  ;;  %v362_v45 = vpop.f32.mrb[5].mxu1 }
 0x221   :  { %v363_v46 = vadd.f32 %v850_v28, %v362_v45  ;;  %v984_v47 = vpop.f32.mrb[6].mxu1  ;;  %985 = vmatprep.subr.bf16.mxu0 %v385_v42 }
 0x222   :  { %v374_v48 = vadd.f32 %v984_v47, %v850_v28  ;;  %v365_v49 = vpop.f32.mrb[7].mxu1  ;;  %986 = vmatpush3.bf16.msra.mxu0 %v385_v42  ;;  %v383_v51 = vmax.f32 %v371_v44, 0.0 }
 0x223   :  { %v366_v50 = vadd.f32 %v850_v28, %v365_v49  ;;  %987 = vmatprep.subr.bf16.mxu0 %v386_v41  ;;  %v381_v53 = vmax.f32 %v363_v46, 0.0 }
 0x224   :  { %v384_v52 = vmax.f32 %v374_v48, 0.0 }
 0x225   :  { %v382_v54 = vmax.f32 %v366_v50, 0.0 }
 0x226   :  { %v388_v55 = vpack.c.bf16 %v384_v52, %v383_v51  ;;  %988 = vmatpush3.bf16.msra.mxu0 %v386_v41 }
 0x227   :  { %v387_v56 = vpack.c.bf16 %v382_v54, %v381_v53 }
 0x229   :  { %989 = vmatprep.subr.bf16.mxu0 %v387_v56 }
 0x22a   :  { %990 = vmatpush3.bf16.msra.mxu0 %v387_v56 }
 0x22b   :  { %991 = vmatprep.subr.bf16.mxu0 %v388_v55 }
 0x22e   :  { %992 = vmatpush3.bf16.msra.mxu0 %v388_v55 }
 0x22f   :  { %1001 = vmatprep.subr.bf16.mxu0 %v1099_v57 }
 0x231   :  { %994 = vmatmul.mubr.msk.bf16.vlgmr.msra.gmra.mrb[8].mxu0 %vm176_vm0, %v1403_v7 }
 0x232   :  { %997 = vmatprep.mubr.msk.bf16.mxu0 %vm176_vm0, %v1405_v9  ;;  %1002 = vmatpush3.bf16.msra.mxu0 %v1099_v57 }
 0x233   :  { %1003 = vmatprep.subr.bf16.mxu0 %v1100_v58 }
 0x236   :  { %1004 = vmatpush3.bf16.msra.mxu0 %v1100_v58 }
 0x237   :  { %1005 = vmatprep.subr.bf16.mxu0 %v1101_v59 }
 0x239   :  { %998 = vmatmul.mubr.msk.bf16.gmra.mrb[12].mxu0 %vm176_vm0, %v1411_v12 }
 0x23a   :  { %1006 = vmatpush3.bf16.msra.mxu0 %v1101_v59 }
 0x23b   :  { %1007 = vmatprep.subr.bf16.mxu0 %v1102_v60 }
 0x23e   :  { %1008 = vmatpush3.bf16.msra.mxu0 %v1102_v60 }
 0x23f   :  { %1009 = vmatprep.subr.bf16.mxu0 %v1103_v61 }
 0x242   :  { %1010 = vmatpush3.bf16.msra.mxu0 %v1103_v61 }
 0x243   :  { %1011 = vmatprep.subr.bf16.mxu0 %v1104_v62 }
 0x246   :  { %1012 = vmatpush3.bf16.msra.mxu0 %v1104_v62 }
 0x247   :  { %1013 = vmatprep.subr.bf16.mxu0 %v1105_v63 }
 0x24a   :  { %1014 = vmatpush3.bf16.msra.mxu0 %v1105_v63 }
 0x24b   :  { %1015 = vmatprep.subr.bf16.mxu0 %v1106_v0 }
 0x24e   :  { %1016 = vmatpush3.bf16.msra.mxu0 %v1106_v0  ;;  %v880_v0 = vld [vmem:[%s1459_s7] ss:$0 sm:$0xff]  ;;  %s1225_s7 = scalar_lea.vmem %s825_s23, 1024 }
 0x24f   :  { %p1226_p12 = scmp.ne.s32.totalorder %s825_s23, %s1225_s7  ;;  %p1231_p0 = scmp.lt.s32.totalorder %s1225_s7, %s1225_s7 }
 0x251   :  { %p1232_p1 = por %p1231_p0, %p1230_p13 }
 0x253   :  { %p1233_p2 = pnand %p1232_p1, %p1226_p12 }
 0x304   :  { %v995_v10 = vpop.f32.mrb[8].mxu0 }
 0x305   :  { %v440_v11 = vpop.f32.mrb[9].mxu0 }
 0x306   :  { %v996_v13 = vpop.f32.mrb[10].mxu0 }
 0x307   :  { %v472_v14 = vpack.c.bf16 %v996_v13, %v995_v10  ;;  %v443_v15 = vpop.f32.mrb[11].mxu0 }
 0x308   :  { %v471_v16 = vpack.c.bf16 %v443_v15, %v440_v11 }
 0x30a   :  { %1017 = vmatprep.mubr.bf16.mxu0 %v471_v16 }
 0x30b   :  { %1018 = vmatmul.mubr.bf16.vlgmr.msra.gmra.mrb[16].mxu0 %v472_v14 }
 0x30c   :  { %v999_v17 = vpop.f32.mrb[12].mxu0 }
 0x30d   :  { %v456_v18 = vpop.f32.mrb[13].mxu0 }
 0x30e   :  { %v1000_v19 = vpop.f32.mrb[14].mxu0 }
 0x30f   :  { %v474_v20 = vpack.c.bf16 %v1000_v19, %v999_v17  ;;  %v459_v21 = vpop.f32.mrb[15].mxu0 }
 0x310   :  { %v473_v22 = vpack.c.bf16 %v459_v21, %v456_v18 }
 0x312   :  { %1021 = vmatprep.mubr.bf16.mxu0 %v473_v22 }
 0x313   :  { %1022 = vmatmul.mubr.bf16.gmra.mrb[20].mxu0 %v474_v20 }
 0x314   :  { %1057 = vmatprep.mubr.msk.bf16.mxu0 %vm176_vm0, %v1399_v3 }
 0x3de   :  { %v1019_v26 = vpop.f32.mrb[16].mxu0 }
 0x3df   :  { %v572_v27 = vadd.f32 %v1019_v26, %v863_v25  ;;  %v563_v28 = vpop.f32.mrb[17].mxu0 }
 0x3e0   :  { %v564_v29 = vadd.f32 %v863_v25, %v563_v28  ;;  %v1020_v30 = vpop.f32.mrb[18].mxu0 }
 0x3e1   :  { %v575_v31 = vadd.f32 %v1020_v30, %v863_v25  ;;  %v566_v32 = vpop.f32.mrb[19].mxu0  ;;  %v596_v34 = vmax.f32 %v572_v27, 0.0 }
 0x3e2   :  { %v567_v33 = vadd.f32 %v863_v25, %v566_v32  ;;  %v594_v35 = vmax.f32 %v564_v29, 0.0 }
 0x3e3   :  { %v597_v3 = vmax.f32 %v575_v31, 0.0 }
 0x3e4   :  { %v595_v36 = vmax.f32 %v567_v33, 0.0 }
 0x3e5   :  { %v603_v37 = vpack.c.bf16 %v597_v3, %v596_v34 }
 0x3e6   :  { %v602_v38 = vpack.c.bf16 %v595_v36, %v594_v35  ;;  %v1023_v39 = vpop.f32.mrb[20].mxu0 }
 0x3e7   :  { %v588_v40 = vadd.f32 %v1023_v39, %v863_v25  ;;  %v579_v41 = vpop.f32.mrb[21].mxu0 }
 0x3e8   :  { %v580_v42 = vadd.f32 %v863_v25, %v579_v41  ;;  %v1024_v43 = vpop.f32.mrb[22].mxu0  ;;  %1041 = vmatprep.mubr.bf16.mxu1 %v602_v38 }
 0x3e9   :  { %v591_v44 = vadd.f32 %v1024_v43, %v863_v25  ;;  %v582_v45 = vpop.f32.mrb[23].mxu0  ;;  %1042 = vmatmul.mubr.bf16.vlgmr.msra.gmra.mrb[8].mxu1 %v603_v37  ;;  %v600_v47 = vmax.f32 %v588_v40, 0.0 }
 0x3ea   :  { %v583_v46 = vadd.f32 %v863_v25, %v582_v45  ;;  %v598_v49 = vmax.f32 %v580_v42, 0.0 }
 0x3eb   :  { %v601_v48 = vmax.f32 %v591_v44, 0.0 }
 0x3ec   :  { %v599_v50 = vmax.f32 %v583_v46, 0.0 }
 0x3ed   :  { %v605_v51 = vpack.c.bf16 %v601_v48, %v600_v47 }
 0x3ee   :  { %v604_v52 = vpack.c.bf16 %v599_v50, %v598_v49 }
 0x3f0   :  { %1045 = vmatprep.mubr.bf16.mxu1 %v604_v52 }
 0x3f1   :  { %1046 = vmatmul.mubr.bf16.gmra.mrb[12].mxu1 %v605_v51 }
 0x3f2   :  { %1061 = vmatprep.mubr.msk.bf16.mxu1 %vm176_vm0, %v1405_v9 }
 0x4bc   :  { %v1043_v53 = vpop.f32.mrb[8].mxu1 }
 0x4bd   :  { %v705_v54 = vpop.f32.mrb[9].mxu1 }
 0x4be   :  { %v1044_v55 = vpop.f32.mrb[10].mxu1 }
 0x4bf   :  { %v737_v56 = vpack.c.bf16 %v1044_v55, %v1043_v53  ;;  %v708_v57 = vpop.f32.mrb[11].mxu1 }
 0x4c0   :  { %v736_v58 = vpack.c.bf16 %v708_v57, %v705_v54 }
 0x4c2   :  { %1049 = vmatprep.subr.bf16.mxu0 %v736_v58  ;;  %1065 = vmatprep.subr.bf16.mxu1 %v736_v58 }
 0x4c3   :  { %1050 = vmatpush3.bf16.msra.mxu0 %v736_v58  ;;  %1069 = vmatpush3.bf16.msra.mxu1 %v736_v58 }
 0x4c4   :  { %v1047_v59 = vpop.f32.mrb[12].mxu1  ;;  %1051 = vmatprep.subr.bf16.mxu0 %v737_v56  ;;  %1066 = vmatprep.subr.bf16.mxu1 %v737_v56 }
 0x4c5   :  { %v721_v60 = vpop.f32.mrb[13].mxu1 }
 0x4c6   :  { %v1048_v61 = vpop.f32.mrb[14].mxu1 }
 0x4c7   :  { %v739_v62 = vpack.c.bf16 %v1048_v61, %v1047_v59  ;;  %v724_v63 = vpop.f32.mrb[15].mxu1  ;;  %1052 = vmatpush3.bf16.msra.mxu0 %v737_v56  ;;  %1070 = vmatpush3.bf16.msra.mxu1 %v737_v56 }
 0x4c8   :  { %v738_v9 = vpack.c.bf16 %v724_v63, %v721_v60 }
 0x4ca   :  { %1053 = vmatprep.subr.bf16.mxu0 %v738_v9  ;;  %1067 = vmatprep.subr.bf16.mxu1 %v738_v9 }
 0x4cb   :  { %1054 = vmatpush3.bf16.msra.mxu0 %v738_v9  ;;  %1071 = vmatpush3.bf16.msra.mxu1 %v738_v9 }
 0x4cc   :  { %1055 = vmatprep.subr.bf16.mxu0 %v739_v62  ;;  %1068 = vmatprep.subr.bf16.mxu1 %v739_v62 }
 0x4cf   :  { %1056 = vmatpush3.bf16.msra.mxu0 %v739_v62  ;;  %1072 = vmatpush3.bf16.msra.mxu1 %v739_v62 }
 0x4d2   :  { %1058 = vmatmul.mubr.msk.bf16.vlgmr.msra.gmra.mrb[24].mxu0 %vm176_vm0, %v1403_v7  ;;  %1062 = vmatmul.mubr.msk.bf16.vlgmr.msra.gmra.mrb[16].mxu1 %vm176_vm0, %v1411_v12 }
 0x5a5   :  { %v1059_v1 = vpop.f32.mrb[24].mxu0  ;;  %v1063_v2 = vpop.f32.mrb[16].mxu1 }
 0x5a6   :  { %v789_v4 = vadd.f32 %v1059_v1, %v880_v0  ;;  %v805_v5 = vadd.f32 %v1063_v2, %v880_v0  ;;  %v780_v6 = vpop.f32.mrb[25].mxu0  ;;  %v796_v8 = vpop.f32.mrb[17].mxu1 }
 0x5a7   :  { %v781_v10 = vadd.f32 %v880_v0, %v780_v6  ;;  %v797_v11 = vadd.f32 %v880_v0, %v796_v8  ;;  %v1060_v13 = vpop.f32.mrb[26].mxu0  ;;  %v1064_v14 = vpop.f32.mrb[18].mxu1 }
 0x5a8   :  { %813 = vst [vmem:[#allocation11 + $0x10] sm:$0xff] %v789_v4  ;;  %817 = vst [vmem:[#allocation11 + $0x30] sm:$0xff] %v805_v5  ;;  %v792_v7 = vadd.f32 %v1060_v13, %v880_v0  ;;  %v808_v12 = vadd.f32 %v1064_v14, %v880_v0  ;;  %v783_v15 = vpop.f32.mrb[27].mxu0  ;;  %v799_v16 = vpop.f32.mrb[19].mxu1 }
 0x5a9   :  { %811 = vst [vmem:[#allocation11] sm:$0xff] %v781_v10  ;;  %815 = vst [vmem:[#allocation11 + $0x20] sm:$0xff] %v797_v11  ;;  %v784_v17 = vadd.f32 %v880_v0, %v783_v15  ;;  %v800_v18 = vadd.f32 %v880_v0, %v799_v16 }
 0x5aa   :  { %814 = vst [vmem:[#allocation11 + $0x18] sm:$0xff] %v792_v7  ;;  %818 = vst [vmem:[#allocation11 + $0x38] sm:$0xff] %v808_v12 }
 0x5ab   :  { %812 = vst [vmem:[#allocation11 + $0x8] sm:$0xff] %v784_v17  ;;  %816 = vst [vmem:[#allocation11 + $0x28] sm:$0xff] %v800_v18 }
 0x5ac   :  { %1236 = shalt.err (!%p1233_p2)
}
 0x5ad   :  { %s1237_s26 = scalar_lea.hbm %s1460_s8, 1024 }
 0x5ae   :  { %p1238_p3 = scmp.ne.s32.totalorder %s1460_s8, %s1237_s26  ;;  %p1241_p4 = scmp.lt.u32.totalorder %s1237_s26, %s1460_s8 }
 0x5b0   :  { %p1243_p5 = pnand %p1241_p4, %p1238_p3 }
 0x5b2   :  { %1246 = shalt.err (!%p1243_p5)
}
 0x5b3   :  { %s1263_s0 = smov 128   ;;  %s1264_s9 = smov 8  }
 0x5b4   :  { %830 = dma.vmem_to_hbm [thread:$0]  %s825_s23, 1024, %s1460_s8, [#allocation4], %s1263_s0, %s1263_s0, %s1264_s9  }
 0x5b5   :  { %1253 = dma.done.wait [#allocation4], 1024  }
 0x5b6   :  { %1254 = vsyncadd [#allocation4], 4294966272 }
 0x5b7   :  { %834 = vsyncpa [#allocation3], 1 }
 0x5b8   :  { %835 = vsyncpa [#allocation6], 1 }
 0x5b9   :  { %836 = vsyncpa [#allocation9], 1 }
 0x5ba   :  { %837 = vsyncpa [#allocation4], 1 }

</bundles_post_ra>
